<compile_context>
chip_gen: v7x
topology: tpu7x:2x2x1
jax: 0.10.0
libtpu: 0.0.40
codegen_flags: <defaults>
</compile_context>

<pallas_src>
import functools

import jax
import jax.numpy as jnp
from jax.experimental import pallas as pl
from jax.experimental.pallas import tpu as pltpu

_LANES = 128


def _cdiv(a, b):
    return -(-a // b)


def _vmem_capacity_bytes():
    """Physical per-core VMEM, with a conservative fallback (v7x = 64 MiB)."""
    try:
        info = pltpu.get_tpu_info()
        cap = getattr(info, "vmem_capacity_bytes", None)
        if cap:
            return int(cap)
    except Exception:
        pass
    return 64 * 1024 * 1024


def _tversky_partial_kernel(gt_ref, pred_ref, out_ref,
                            tp_acc, sp_acc, sg_acc, *,
                            n_classes, tm, hw, tiles_per_split, num_tiles,
                            apply_softmax, pad_exists, has_invalid):
    s = pl.program_id(1)
    t = pl.program_id(2)
    tile_idx = s * tiles_per_split + t

    @pl.when(t == 0)
    def _():
        tp_acc[...] = jnp.zeros_like(tp_acc)
        sp_acc[...] = jnp.zeros_like(sp_acc)
        sg_acc[...] = jnp.zeros_like(sg_acc)

    aligned = (tm % 8 == 0)

    def _red(x):
        # (tm, 128) -> (8, 128).  Aligned case: pure vreg-wise VALU adds
        # (no XLU); the final 8-sublane fold happens in the JAX epilogue.
        if aligned:
            return jnp.sum(x.reshape(tm // 8, 8, _LANES), axis=0)
        r = jnp.sum(x, axis=0, keepdims=True)                     # (1, 128)
        rows = jax.lax.broadcasted_iota(jnp.int32, (8, _LANES), 0)
        return jnp.where(rows == 0, r, 0.0)

    def _accumulate(masked):
        gt = gt_ref[...].astype(jnp.int32)                        # (tm, 128)
        if masked:
            row = jax.lax.broadcasted_iota(jnp.int32, (tm, _LANES), 0)
            lane = jax.lax.broadcasted_iota(jnp.int32, (tm, _LANES), 1)
            pix = tile_idx * (tm * _LANES) + row * _LANES + lane
            valid = pix < hw
        if apply_softmax:
            # Memory-frugal fused softmax over the small class axis: only
            # (tm, 128) temporaries + C held exponentials are live.
            m = pred_ref[0].astype(jnp.float32)
            for c in range(1, n_classes):
                m = jnp.maximum(m, pred_ref[c].astype(jnp.float32))
            es = [jnp.exp(pred_ref[c].astype(jnp.float32) - m)
                  for c in range(n_classes)]
            denom = es[0]
            for c in range(1, n_classes):
                denom = denom + es[c]
            inv = pl.reciprocal(denom, approx=True)               # EUP, not VPU div
        for c in range(n_classes):
            if apply_softmax:
                p_c = es[c] * inv
            else:
                p_c = pred_ref[c].astype(jnp.float32)
            g_b = gt == c
            if masked:
                # jnp.where (not a multiply) so garbage/NaN in the padded
                # region of the boundary block can never leak through.
                p_c = jnp.where(valid, p_c, 0.0)
                g_b = jnp.logical_and(g_b, valid)
            g_c = g_b.astype(jnp.float32)
            tp_acc[c] += _red(g_c * p_c)
            sp_acc[c] += _red(p_c)
            sg_acc[c] += _red(g_c)

    last = num_tiles - 1
    if pad_exists:
        # Masking is only needed on the tail tile; interior tiles run mask-free.
        @pl.when(tile_idx == last)
        def _():
            _accumulate(True)

        @pl.when(tile_idx < last)
        def _():
            _accumulate(False)
    elif has_invalid:
        @pl.when(tile_idx <= last)
        def _():
            _accumulate(False)
    else:
        _accumulate(False)

    @pl.when(t == pl.num_programs(2) - 1)
    def _():
        out_ref[pl.ds(0, n_classes), :, :] = tp_acc[...]
        out_ref[pl.ds(n_classes, n_classes), :, :] = sp_acc[...]
        out_ref[pl.ds(2 * n_classes, n_classes), :, :] = sg_acc[...]


def tversky_loss_pallas(prediction, ground_truth, n_classes,
                        alpha=0.7, gamma=0.75, weight=None,
                        softmax=False, smooth=1e-5, tile_rows=None):
    """Focal Tversky loss matching PyTorch TverskyLoss.forward."""
    B, C, H, W = prediction.shape
    assert C == n_classes, "channel dim must equal n_classes"
    assert ground_truth.shape == (B, H, W)
    HW = H * W
    nt_raw = _cdiv(HW, _LANES)                     # 128-lane pixel rows

    # Native dtypes end-to-end: no host upcast of pred, no host widening of gt.
    pred = prediction.reshape(B, C, HW)
    gt = ground_truth.reshape(B, HW)
    if not jnp.issubdtype(gt.dtype, jnp.integer):
        gt = gt.astype(jnp.int32)
    if nt_raw * _LANES != HW:
        # Only when HW is not lane-aligned (rare); pad to the next 128 multiple.
        # Padded pixels are removed by the in-kernel index mask.
        extra = nt_raw * _LANES - HW
        pred = jnp.pad(pred, ((0, 0), (0, 0), (0, extra)))
        gt = jnp.pad(gt, ((0, 0), (0, extra)))
    pred = pred.reshape(B, C, nt_raw, _LANES)
    gt = gt.reshape(B, nt_raw, _LANES)

    # ---------------- generation-aware tile selection ----------------
    pred_bytes = pred.dtype.itemsize
    lbl_bytes = gt.dtype.itemsize
    cap = _vmem_capacity_bytes()
    vmem_limit = int(min(cap * 3 // 4, 100 * 2**20))
    budget = int(vmem_limit * 0.7)                 # headroom: accs/out/compiler scratch
    temps_f32 = (C + 6) if softmax else 8          # live f32 temporaries per pixel-row
    per_row = _LANES * (2 * C * pred_bytes + 2 * lbl_bytes + 4 * temps_f32)
    tm_cap = max(32, min(1024, (budget // per_row) // 32 * 32))
    if tile_rows is not None:
        tm_cap = min(tm_cap, max(32, (int(tile_rows) // 32) * 32))
    if B == 1:
        # Keep >= ~4 pixel tiles so the 2-way core split (v7x) and the DMA
        # pipeline both have work even for a single image.
        tm_cap = min(tm_cap, max(32, ((_cdiv(nt_raw, 4) + 31) // 32) * 32))

    if nt_raw <= 32 or (nt_raw <= tm_cap and nt_raw % 8 == 0):
        tm = nt_raw                                # whole image rows in one block
    else:
        tm = min(tm_cap, (nt_raw // 32) * 32)      # 32-row multiple: f32/bf16/int8 ok

    num_tiles = _cdiv(nt_raw, tm)
    n_splits = 2 if (B == 1 and num_tiles >= 4) else 1
    tps = _cdiv(num_tiles, n_splits)
    pad_exists = (num_tiles * tm * _LANES != HW)
    has_invalid = (tps * n_splits != num_tiles)

    if has_invalid:
        def _tile(s, t):
            return jnp.minimum(s * tps + t, num_tiles - 1)
    else:
        def _tile(s, t):
            return s * tps + t

    kernel = functools.partial(
        _tversky_partial_kernel,
        n_classes=C, tm=tm, hw=HW, tiles_per_split=tps, num_tiles=num_tiles,
        apply_softmax=bool(softmax), pad_exists=pad_exists,
        has_invalid=has_invalid)

    cost = pl.CostEstimate(
        flops=int(8 * B * C * HW),
        transcendentals=int(B * C * HW) if softmax else 0,
        bytes_accessed=int(B * C * nt_raw * _LANES * pred_bytes
                           + B * nt_raw * _LANES * lbl_bytes
                           + B * n_splits * 3 * C * 8 * _LANES * 4))

    partials = pl.pallas_call(
        kernel,
        out_shape=jax.ShapeDtypeStruct((B, n_splits, 3 * C, 8, _LANES),
                                       jnp.float32),
        grid_spec=pltpu.PrefetchScalarGridSpec(
            num_scalar_prefetch=0,
            grid=(B, n_splits, tps),
            in_specs=[
                # labels: (B, NT, 128) -> kernel sees (tm, 128)
                pl.BlockSpec((pl.Squeezed(), tm, _LANES),
                             lambda b, s, t: (b, _tile(s, t), 0)),
                # prediction: (B, C, NT, 128) -> kernel sees (C, tm, 128)
                pl.BlockSpec((pl.Squeezed(), C, tm, _LANES),
                             lambda b, s, t: (b, 0, _tile(s, t), 0)),
            ],
            # per-(batch, split) partials [tp | sum_p | sum_g], each (C, 8, 128)
            out_specs=pl.BlockSpec(
                (pl.Squeezed(), pl.Squeezed(), 3 * C, 8, _LANES),
                lambda b, s, t: (b, s, 0, 0, 0)),
            scratch_shapes=[pltpu.VMEM((C, 8, _LANES), jnp.float32)] * 3,
        ),
        compiler_params=pltpu.CompilerParams(
            dimension_semantics=("parallel", "parallel", "arbitrary"),
            vmem_limit_bytes=vmem_limit),
        cost_estimate=cost,
    )(gt, pred)

    # Tiny epilogue in plain JAX: fold batch/split/sublane/lane, then Tversky.
    sums = jnp.sum(partials.reshape(B, n_splits, 3, C, 8, _LANES),
                   axis=(0, 1, 4, 5))              # (3, C)
    tp, sp, sg = sums[0], sums[1], sums[2]
    fn = sg - tp
    fp = sp - tp
    tv = (tp + smooth) / (tp + alpha * fn + (1.0 - alpha) * fp + smooth)
    focal = jnp.power(1.0 - tv, gamma)             # (C,)
    if weight is None:
        w = jnp.ones((C,), jnp.float32)
    else:
        w = jnp.asarray(weight, jnp.float32).reshape(C)
    return jnp.sum(w * focal) / float(n_classes)


def tversky_loss_ref(prediction, ground_truth, n_classes,
                     alpha=0.7, gamma=0.75, weight=None,
                     softmax=False, smooth=1e-5):
    """Pure-JAX reference mirroring the PyTorch module."""
    if softmax:
        prediction = jax.nn.softmax(prediction.astype(jnp.float32), axis=1)
    else:
        prediction = prediction.astype(jnp.float32)
    g = jax.nn.one_hot(ground_truth, n_classes, axis=1, dtype=jnp.float32)
    w = [1.0] * n_classes if weight is None else list(weight)
    loss = 0.0
    for i in range(n_classes):
        p_i = prediction[:, i]
        g_i = g[:, i]
        tp = jnp.sum(g_i * p_i)
        fn = jnp.sum(g_i * (1.0 - p_i))
        fp = jnp.sum((1.0 - g_i) * p_i)
        tv = (tp + smooth) / (tp + alpha * fn + (1.0 - alpha) * fp + smooth)
        loss = loss + jnp.power(1.0 - tv, gamma) * w[i]
    return loss / n_classes


if __name__ == "__main__":
    key = jax.random.PRNGKey(0)
    k1, k2, k3, k4 = jax.random.split(key, 4)

    # 1) Canonical small shapes: B=2, C=4, 16x16, fused softmax, int8 labels.
    B, C, H, W = 2, 4, 16, 16
    logits = jax.random.normal(k1, (B, C, H, W), dtype=jnp.float32)
    labels = jax.random.randint(k2, (B, H, W), 0, C, dtype=jnp.int32)
    labels8 = labels.astype(jnp.int8)   # narrow labels stay narrow in the kernel

    out = jax.block_until_ready(tversky_loss_pallas(logits, labels8, C,
                                                    softmax=True))
    ref = tversky_loss_ref(logits, labels, C, softmax=True)
    assert jnp.allclose(out, ref, atol=1e-4, rtol=2e-3), (out, ref)

    # 2) Probability inputs + per-class weights, no softmax.
    probs = jax.nn.softmax(logits, axis=1)
    wts = [1.0, 2.0, 0.5, 1.5]
    out_w = jax.block_until_ready(
        tversky_loss_pallas(probs, labels8, C, weight=wts, softmax=False))
    ref_w = tversky_loss_ref(probs, labels, C, weight=wts, softmax=False)
    assert jnp.allclose(out_w, ref_w, atol=1e-5, rtol=1e-4), (out_w, ref_w)

    # 3) bf16 logits (native-dtype DMA) + multi-tile + 2-way core split (B=1).
    B3, C3, H3, W3 = 1, 4, 128, 128
    logits3 = jax.random.normal(k3, (B3, C3, H3, W3),
                                dtype=jnp.float32).astype(jnp.bfloat16)
    labels3 = jax.random.randint(k4, (B3, H3, W3), 0, C3, dtype=jnp.int32)
    out3 = jax.block_until_ready(tversky_loss_pallas(logits3, labels3, C3,
                                                     softmax=True))
    ref3 = tversky_loss_ref(logits3.astype(jnp.float32), labels3, C3,
                            softmax=True)
    assert jnp.allclose(out3, ref3, atol=1e-4, rtol=2e-3), (out3, ref3)

    # 4) Non-lane-aligned spatial size -> in-kernel index-mask path.
    B4, C4, H4, W4 = 2, 3, 15, 15
    probs4 = jax.nn.softmax(
        jax.random.normal(k1, (B4, C4, H4, W4), dtype=jnp.float32), axis=1)
    labels4 = jax.random.randint(k2, (B4, H4, W4), 0, C4, dtype=jnp.int32)
    out4 = jax.block_until_ready(tversky_loss_pallas(probs4, labels4, C4,
                                                     softmax=False))
    ref4 = tversky_loss_ref(probs4, labels4, C4, softmax=False)
    assert jnp.allclose(out4, ref4, atol=1e-5, rtol=1e-4), (out4, ref4)

    print("KERNEL_OK")
</pallas_src>

<mosaic_0001>
module attributes {stable_mosaic.version = 11 : i64} {
  func.func @_tversky_partial_kernel(%arg0: i32, %arg1: i32, %arg2: i32, %arg3: memref<1x2x128xi8, #tpu.memory_space<vmem>>, %arg4: memref<1x4x2x128xf32, #tpu.memory_space<vmem>>, %arg5: memref<1x1x12x8x128xf32, #tpu.memory_space<vmem>>, %arg6: memref<4x8x128xf32, #tpu.memory_space<vmem>>, %arg7: memref<4x8x128xf32, #tpu.memory_space<vmem>>, %arg8: memref<4x8x128xf32, #tpu.memory_space<vmem>>) attributes {dimension_semantics = [#tpu.dimension_semantics<parallel>, #tpu.dimension_semantics<parallel>, #tpu.dimension_semantics<arbitrary>], iteration_bounds = array<i64: 2, 1, 1>, scalar_prefetch = 0 : i64, scratch_operands = 3 : i64, tpu.core_type = #tpu.core_type<tc>, window_params = [{transform_indices = @transform_0, window_bounds = array<i64: 1, 2, 128>}, {transform_indices = @transform_1, window_bounds = array<i64: 1, 4, 2, 128>}, {transform_indices = @transform_2, window_bounds = array<i64: 1, 1, 12, 8, 128>}]} {
    %c0_i32 = arith.constant 0 : i32
    %0 = arith.cmpi eq, %arg2, %c0_i32 : i32
    %1 = arith.extui %0 : i1 to i32
    %c0_i32_0 = arith.constant 0 : i32
    %2 = arith.cmpi ne, %1, %c0_i32_0 : i32
    scf.if %2 {
      %cst_142 = arith.constant 0.000000e+00 : f32
      %244 = vector.broadcast %cst_142 : f32 to vector<4x8x128xf32>
      %c0_143 = arith.constant 0 : index
      %c0_144 = arith.constant 0 : index
      %c0_145 = arith.constant 0 : index
      %245 = vector.load %arg6[%c0_143, %c0_144, %c0_145] : memref<4x8x128xf32, #tpu.memory_space<vmem>>, vector<4x8x128xf32>
      tpu.vector_store %arg6[%c0_143, %c0_144, %c0_145], %244 {strides = array<i32>} : memref<4x8x128xf32, #tpu.memory_space<vmem>>, vector<4x8x128xf32>,
      %cst_146 = arith.constant 0.000000e+00 : f32
      %246 = vector.broadcast %cst_146 : f32 to vector<4x8x128xf32>
      %c0_147 = arith.constant 0 : index
      %c0_148 = arith.constant 0 : index
      %c0_149 = arith.constant 0 : index
      %247 = vector.load %arg7[%c0_147, %c0_148, %c0_149] : memref<4x8x128xf32, #tpu.memory_space<vmem>>, vector<4x8x128xf32>
      tpu.vector_store %arg7[%c0_147, %c0_148, %c0_149], %246 {strides = array<i32>} : memref<4x8x128xf32, #tpu.memory_space<vmem>>, vector<4x8x128xf32>,
      %cst_150 = arith.constant 0.000000e+00 : f32
      %248 = vector.broadcast %cst_150 : f32 to vector<4x8x128xf32>
      %c0_151 = arith.constant 0 : index
      %c0_152 = arith.constant 0 : index
      %c0_153 = arith.constant 0 : index
      %249 = vector.load %arg8[%c0_151, %c0_152, %c0_153] : memref<4x8x128xf32, #tpu.memory_space<vmem>>, vector<4x8x128xf32>
      tpu.vector_store %arg8[%c0_151, %c0_152, %c0_153], %248 {strides = array<i32>} : memref<4x8x128xf32, #tpu.memory_space<vmem>>, vector<4x8x128xf32>,
    } else {
    }
    %c0 = arith.constant 0 : index
    %c0_1 = arith.constant 0 : index
    %c0_2 = arith.constant 0 : index
    %3 = vector.load %arg3[%c0, %c0_1, %c0_2] : memref<1x2x128xi8, #tpu.memory_space<vmem>>, vector<1x2x128xi8>
    %4 = vector.shape_cast %3 : vector<1x2x128xi8> to vector<2x128xi8>
    %5 = arith.extsi %4 : vector<2x128xi8> to vector<2x128xi32>
    %c0_3 = arith.constant 0 : index
    %c0_4 = arith.constant 0 : index
    %c0_5 = arith.constant 0 : index
    %c0_6 = arith.constant 0 : index
    %6 = vector.load %arg4[%c0_3, %c0_4, %c0_5, %c0_6] : memref<1x4x2x128xf32, #tpu.memory_space<vmem>>, vector<1x1x2x128xf32>
    %7 = vector.shape_cast %6 : vector<1x1x2x128xf32> to vector<2x128xf32>
    %c0_7 = arith.constant 0 : index
    %c1 = arith.constant 1 : index
    %c0_8 = arith.constant 0 : index
    %c0_9 = arith.constant 0 : index
    %8 = vector.load %arg4[%c0_7, %c1, %c0_8, %c0_9] : memref<1x4x2x128xf32, #tpu.memory_space<vmem>>, vector<1x1x2x128xf32>
    %9 = vector.shape_cast %8 : vector<1x1x2x128xf32> to vector<2x128xf32>
    %10 = arith.maximumf %7, %9 : vector<2x128xf32>
    %c0_10 = arith.constant 0 : index
    %c2 = arith.constant 2 : index
    %c0_11 = arith.constant 0 : index
    %c0_12 = arith.constant 0 : index
    %11 = vector.load %arg4[%c0_10, %c2, %c0_11, %c0_12] : memref<1x4x2x128xf32, #tpu.memory_space<vmem>>, vector<1x1x2x128xf32>
    %12 = vector.shape_cast %11 : vector<1x1x2x128xf32> to vector<2x128xf32>
    %13 = arith.maximumf %10, %12 : vector<2x128xf32>
    %c0_13 = arith.constant 0 : index
    %c3 = arith.constant 3 : index
    %c0_14 = arith.constant 0 : index
    %c0_15 = arith.constant 0 : index
    %14 = vector.load %arg4[%c0_13, %c3, %c0_14, %c0_15] : memref<1x4x2x128xf32, #tpu.memory_space<vmem>>, vector<1x1x2x128xf32>
    %15 = vector.shape_cast %14 : vector<1x1x2x128xf32> to vector<2x128xf32>
    %16 = arith.maximumf %13, %15 : vector<2x128xf32>
    %c0_16 = arith.constant 0 : index
    %c0_17 = arith.constant 0 : index
    %c0_18 = arith.constant 0 : index
    %c0_19 = arith.constant 0 : index
    %17 = vector.load %arg4[%c0_16, %c0_17, %c0_18, %c0_19] : memref<1x4x2x128xf32, #tpu.memory_space<vmem>>, vector<1x1x2x128xf32>
    %18 = vector.shape_cast %17 : vector<1x1x2x128xf32> to vector<2x128xf32>
    %19 = arith.subf %18, %16 : vector<2x128xf32>
    %20 = math.exp %19 : vector<2x128xf32>
    %c0_20 = arith.constant 0 : index
    %c1_21 = arith.constant 1 : index
    %c0_22 = arith.constant 0 : index
    %c0_23 = arith.constant 0 : index
    %21 = vector.load %arg4[%c0_20, %c1_21, %c0_22, %c0_23] : memref<1x4x2x128xf32, #tpu.memory_space<vmem>>, vector<1x1x2x128xf32>
    %22 = vector.shape_cast %21 : vector<1x1x2x128xf32> to vector<2x128xf32>
    %23 = arith.subf %22, %16 : vector<2x128xf32>
    %24 = math.exp %23 : vector<2x128xf32>
    %c0_24 = arith.constant 0 : index
    %c2_25 = arith.constant 2 : index
    %c0_26 = arith.constant 0 : index
    %c0_27 = arith.constant 0 : index
    %25 = vector.load %arg4[%c0_24, %c2_25, %c0_26, %c0_27] : memref<1x4x2x128xf32, #tpu.memory_space<vmem>>, vector<1x1x2x128xf32>
    %26 = vector.shape_cast %25 : vector<1x1x2x128xf32> to vector<2x128xf32>
    %27 = arith.subf %26, %16 : vector<2x128xf32>
    %28 = math.exp %27 : vector<2x128xf32>
    %c0_28 = arith.constant 0 : index
    %c3_29 = arith.constant 3 : index
    %c0_30 = arith.constant 0 : index
    %c0_31 = arith.constant 0 : index
    %29 = vector.load %arg4[%c0_28, %c3_29, %c0_30, %c0_31] : memref<1x4x2x128xf32, #tpu.memory_space<vmem>>, vector<1x1x2x128xf32>
    %30 = vector.shape_cast %29 : vector<1x1x2x128xf32> to vector<2x128xf32>
    %31 = arith.subf %30, %16 : vector<2x128xf32>
    %32 = math.exp %31 : vector<2x128xf32>
    %33 = arith.addf %20, %24 : vector<2x128xf32>
    %34 = arith.addf %33, %28 : vector<2x128xf32>
    %35 = arith.addf %34, %32 : vector<2x128xf32>
    %36 = tpu.reciprocal %35 {approx = true} : vector<2x128xf32> -> vector<2x128xf32>
    %37 = arith.mulf %20, %36 : vector<2x128xf32>
    %c0_i32_32 = arith.constant 0 : i32
    %38 = vector.broadcast %c0_i32_32 : i32 to vector<2x128xi32>
    %39 = arith.cmpi eq, %5, %38 : vector<2x128xi32>
    %40 = arith.extui %39 : vector<2x128xi1> to vector<2x128xi32>
    %41 = arith.sitofp %40 : vector<2x128xi32> to vector<2x128xf32>
    %c0_33 = arith.constant 0 : index
    %c0_34 = arith.constant 0 : index
    %c0_35 = arith.constant 0 : index
    %42 = vector.load %arg6[%c0_33, %c0_34, %c0_35] : memref<4x8x128xf32, #tpu.memory_space<vmem>>, vector<1x8x128xf32>
    %43 = vector.shape_cast %42 : vector<1x8x128xf32> to vector<8x128xf32>
    %44 = arith.mulf %41, %37 : vector<2x128xf32>
    %cst = arith.constant dense<0.000000e+00> : vector<128xf32>
    %45 = vector.multi_reduction <add>, %44, %cst [0] : vector<2x128xf32> to vector<128xf32>
    %46 = vector.shape_cast %45 : vector<128xf32> to vector<1x128xf32>
    %47 = tpu.iota {dimensions = array<i32: 0>} : vector<8x128xi32>
    %c0_i32_36 = arith.constant 0 : i32
    %48 = vector.broadcast %c0_i32_36 : i32 to vector<8x128xi32>
    %49 = arith.cmpi eq, %47, %48 : vector<8x128xi32>
    %cst_37 = arith.constant 0.000000e+00 : f32
    %50 = vector.shape_cast %46 : vector<1x128xf32> to vector<1x128xf32>
    %51 = vector.broadcast %50 : vector<1x128xf32> to vector<8x128xf32>
    %52 = vector.broadcast %cst_37 : f32 to vector<8x128xf32>
    %53 = arith.select %49, %51, %52 : vector<8x128xi1>, vector<8x128xf32>
    %54 = arith.addf %43, %53 : vector<8x128xf32>
    %c0_38 = arith.constant 0 : index
    %c0_39 = arith.constant 0 : index
    %c0_40 = arith.constant 0 : index
    %55 = vector.load %arg6[%c0_38, %c0_39, %c0_40] : memref<4x8x128xf32, #tpu.memory_space<vmem>>, vector<1x8x128xf32>
    %56 = vector.shape_cast %55 : vector<1x8x128xf32> to vector<8x128xf32>
    %57 = vector.shape_cast %54 : vector<8x128xf32> to vector<1x8x128xf32>
    tpu.vector_store %arg6[%c0_38, %c0_39, %c0_40], %57 {strides = array<i32>} : memref<4x8x128xf32, #tpu.memory_space<vmem>>, vector<1x8x128xf32>,
    %c0_41 = arith.constant 0 : index
    %c0_42 = arith.constant 0 : index
    %c0_43 = arith.constant 0 : index
    %58 = vector.load %arg7[%c0_41, %c0_42, %c0_43] : memref<4x8x128xf32, #tpu.memory_space<vmem>>, vector<1x8x128xf32>
    %59 = vector.shape_cast %58 : vector<1x8x128xf32> to vector<8x128xf32>
    %cst_44 = arith.constant dense<0.000000e+00> : vector<128xf32>
    %60 = vector.multi_reduction <add>, %37, %cst_44 [0] : vector<2x128xf32> to vector<128xf32>
    %61 = vector.shape_cast %60 : vector<128xf32> to vector<1x128xf32>
    %62 = tpu.iota {dimensions = array<i32: 0>} : vector<8x128xi32>
    %c0_i32_45 = arith.constant 0 : i32
    %63 = vector.broadcast %c0_i32_45 : i32 to vector<8x128xi32>
    %64 = arith.cmpi eq, %62, %63 : vector<8x128xi32>
    %cst_46 = arith.constant 0.000000e+00 : f32
    %65 = vector.shape_cast %61 : vector<1x128xf32> to vector<1x128xf32>
    %66 = vector.broadcast %65 : vector<1x128xf32> to vector<8x128xf32>
    %67 = vector.broadcast %cst_46 : f32 to vector<8x128xf32>
    %68 = arith.select %64, %66, %67 : vector<8x128xi1>, vector<8x128xf32>
    %69 = arith.addf %59, %68 : vector<8x128xf32>
    %c0_47 = arith.constant 0 : index
    %c0_48 = arith.constant 0 : index
    %c0_49 = arith.constant 0 : index
    %70 = vector.load %arg7[%c0_47, %c0_48, %c0_49] : memref<4x8x128xf32, #tpu.memory_space<vmem>>, vector<1x8x128xf32>
    %71 = vector.shape_cast %70 : vector<1x8x128xf32> to vector<8x128xf32>
    %72 = vector.shape_cast %69 : vector<8x128xf32> to vector<1x8x128xf32>
    tpu.vector_store %arg7[%c0_47, %c0_48, %c0_49], %72 {strides = array<i32>} : memref<4x8x128xf32, #tpu.memory_space<vmem>>, vector<1x8x128xf32>,
    %c0_50 = arith.constant 0 : index
    %c0_51 = arith.constant 0 : index
    %c0_52 = arith.constant 0 : index
    %73 = vector.load %arg8[%c0_50, %c0_51, %c0_52] : memref<4x8x128xf32, #tpu.memory_space<vmem>>, vector<1x8x128xf32>
    %74 = vector.shape_cast %73 : vector<1x8x128xf32> to vector<8x128xf32>
    %cst_53 = arith.constant dense<0.000000e+00> : vector<128xf32>
    %75 = vector.multi_reduction <add>, %41, %cst_53 [0] : vector<2x128xf32> to vector<128xf32>
    %76 = vector.shape_cast %75 : vector<128xf32> to vector<1x128xf32>
    %77 = tpu.iota {dimensions = array<i32: 0>} : vector<8x128xi32>
    %c0_i32_54 = arith.constant 0 : i32
    %78 = vector.broadcast %c0_i32_54 : i32 to vector<8x128xi32>
    %79 = arith.cmpi eq, %77, %78 : vector<8x128xi32>
    %cst_55 = arith.constant 0.000000e+00 : f32
    %80 = vector.shape_cast %76 : vector<1x128xf32> to vector<1x128xf32>
    %81 = vector.broadcast %80 : vector<1x128xf32> to vector<8x128xf32>
    %82 = vector.broadcast %cst_55 : f32 to vector<8x128xf32>
    %83 = arith.select %79, %81, %82 : vector<8x128xi1>, vector<8x128xf32>
    %84 = arith.addf %74, %83 : vector<8x128xf32>
    %c0_56 = arith.constant 0 : index
    %c0_57 = arith.constant 0 : index
    %c0_58 = arith.constant 0 : index
    %85 = vector.load %arg8[%c0_56, %c0_57, %c0_58] : memref<4x8x128xf32, #tpu.memory_space<vmem>>, vector<1x8x128xf32>
    %86 = vector.shape_cast %85 : vector<1x8x128xf32> to vector<8x128xf32>
    %87 = vector.shape_cast %84 : vector<8x128xf32> to vector<1x8x128xf32>
    tpu.vector_store %arg8[%c0_56, %c0_57, %c0_58], %87 {strides = array<i32>} : memref<4x8x128xf32, #tpu.memory_space<vmem>>, vector<1x8x128xf32>,
    %88 = arith.mulf %24, %36 : vector<2x128xf32>
    %c1_i32 = arith.constant 1 : i32
    %89 = vector.broadcast %c1_i32 : i32 to vector<2x128xi32>
    %90 = arith.cmpi eq, %5, %89 : vector<2x128xi32>
    %91 = arith.extui %90 : vector<2x128xi1> to vector<2x128xi32>
    %92 = arith.sitofp %91 : vector<2x128xi32> to vector<2x128xf32>
    %c1_59 = arith.constant 1 : index
    %c0_60 = arith.constant 0 : index
    %c0_61 = arith.constant 0 : index
    %93 = vector.load %arg6[%c1_59, %c0_60, %c0_61] : memref<4x8x128xf32, #tpu.memory_space<vmem>>, vector<1x8x128xf32>
    %94 = vector.shape_cast %93 : vector<1x8x128xf32> to vector<8x128xf32>
    %95 = arith.mulf %92, %88 : vector<2x128xf32>
    %cst_62 = arith.constant dense<0.000000e+00> : vector<128xf32>
    %96 = vector.multi_reduction <add>, %95, %cst_62 [0] : vector<2x128xf32> to vector<128xf32>
    %97 = vector.shape_cast %96 : vector<128xf32> to vector<1x128xf32>
    %98 = tpu.iota {dimensions = array<i32: 0>} : vector<8x128xi32>
    %c0_i32_63 = arith.constant 0 : i32
    %99 = vector.broadcast %c0_i32_63 : i32 to vector<8x128xi32>
    %100 = arith.cmpi eq, %98, %99 : vector<8x128xi32>
    %cst_64 = arith.constant 0.000000e+00 : f32
    %101 = vector.shape_cast %97 : vector<1x128xf32> to vector<1x128xf32>
    %102 = vector.broadcast %101 : vector<1x128xf32> to vector<8x128xf32>
    %103 = vector.broadcast %cst_64 : f32 to vector<8x128xf32>
    %104 = arith.select %100, %102, %103 : vector<8x128xi1>, vector<8x128xf32>
    %105 = arith.addf %94, %104 : vector<8x128xf32>
    %c1_65 = arith.constant 1 : index
    %c0_66 = arith.constant 0 : index
    %c0_67 = arith.constant 0 : index
    %106 = vector.load %arg6[%c1_65, %c0_66, %c0_67] : memref<4x8x128xf32, #tpu.memory_space<vmem>>, vector<1x8x128xf32>
    %107 = vector.shape_cast %106 : vector<1x8x128xf32> to vector<8x128xf32>
    %108 = vector.shape_cast %105 : vector<8x128xf32> to vector<1x8x128xf32>
    tpu.vector_store %arg6[%c1_65, %c0_66, %c0_67], %108 {strides = array<i32>} : memref<4x8x128xf32, #tpu.memory_space<vmem>>, vector<1x8x128xf32>,
    %c1_68 = arith.constant 1 : index
    %c0_69 = arith.constant 0 : index
    %c0_70 = arith.constant 0 : index
    %109 = vector.load %arg7[%c1_68, %c0_69, %c0_70] : memref<4x8x128xf32, #tpu.memory_space<vmem>>, vector<1x8x128xf32>
    %110 = vector.shape_cast %109 : vector<1x8x128xf32> to vector<8x128xf32>
    %cst_71 = arith.constant dense<0.000000e+00> : vector<128xf32>
    %111 = vector.multi_reduction <add>, %88, %cst_71 [0] : vector<2x128xf32> to vector<128xf32>
    %112 = vector.shape_cast %111 : vector<128xf32> to vector<1x128xf32>
    %113 = tpu.iota {dimensions = array<i32: 0>} : vector<8x128xi32>
    %c0_i32_72 = arith.constant 0 : i32
    %114 = vector.broadcast %c0_i32_72 : i32 to vector<8x128xi32>
    %115 = arith.cmpi eq, %113, %114 : vector<8x128xi32>
    %cst_73 = arith.constant 0.000000e+00 : f32
    %116 = vector.shape_cast %112 : vector<1x128xf32> to vector<1x128xf32>
    %117 = vector.broadcast %116 : vector<1x128xf32> to vector<8x128xf32>
    %118 = vector.broadcast %cst_73 : f32 to vector<8x128xf32>
    %119 = arith.select %115, %117, %118 : vector<8x128xi1>, vector<8x128xf32>
    %120 = arith.addf %110, %119 : vector<8x128xf32>
    %c1_74 = arith.constant 1 : index
    %c0_75 = arith.constant 0 : index
    %c0_76 = arith.constant 0 : index
    %121 = vector.load %arg7[%c1_74, %c0_75, %c0_76] : memref<4x8x128xf32, #tpu.memory_space<vmem>>, vector<1x8x128xf32>
    %122 = vector.shape_cast %121 : vector<1x8x128xf32> to vector<8x128xf32>
    %123 = vector.shape_cast %120 : vector<8x128xf32> to vector<1x8x128xf32>
    tpu.vector_store %arg7[%c1_74, %c0_75, %c0_76], %123 {strides = array<i32>} : memref<4x8x128xf32, #tpu.memory_space<vmem>>, vector<1x8x128xf32>,
    %c1_77 = arith.constant 1 : index
    %c0_78 = arith.constant 0 : index
    %c0_79 = arith.constant 0 : index
    %124 = vector.load %arg8[%c1_77, %c0_78, %c0_79] : memref<4x8x128xf32, #tpu.memory_space<vmem>>, vector<1x8x128xf32>
    %125 = vector.shape_cast %124 : vector<1x8x128xf32> to vector<8x128xf32>
    %cst_80 = arith.constant dense<0.000000e+00> : vector<128xf32>
    %126 = vector.multi_reduction <add>, %92, %cst_80 [0] : vector<2x128xf32> to vector<128xf32>
    %127 = vector.shape_cast %126 : vector<128xf32> to vector<1x128xf32>
    %128 = tpu.iota {dimensions = array<i32: 0>} : vector<8x128xi32>
    %c0_i32_81 = arith.constant 0 : i32
    %129 = vector.broadcast %c0_i32_81 : i32 to vector<8x128xi32>
    %130 = arith.cmpi eq, %128, %129 : vector<8x128xi32>
    %cst_82 = arith.constant 0.000000e+00 : f32
    %131 = vector.shape_cast %127 : vector<1x128xf32> to vector<1x128xf32>
    %132 = vector.broadcast %131 : vector<1x128xf32> to vector<8x128xf32>
    %133 = vector.broadcast %cst_82 : f32 to vector<8x128xf32>
    %134 = arith.select %130, %132, %133 : vector<8x128xi1>, vector<8x128xf32>
    %135 = arith.addf %125, %134 : vector<8x128xf32>
    %c1_83 = arith.constant 1 : index
    %c0_84 = arith.constant 0 : index
    %c0_85 = arith.constant 0 : index
    %136 = vector.load %arg8[%c1_83, %c0_84, %c0_85] : memref<4x8x128xf32, #tpu.memory_space<vmem>>, vector<1x8x128xf32>
    %137 = vector.shape_cast %136 : vector<1x8x128xf32> to vector<8x128xf32>
    %138 = vector.shape_cast %135 : vector<8x128xf32> to vector<1x8x128xf32>
    tpu.vector_store %arg8[%c1_83, %c0_84, %c0_85], %138 {strides = array<i32>} : memref<4x8x128xf32, #tpu.memory_space<vmem>>, vector<1x8x128xf32>,
    %139 = arith.mulf %28, %36 : vector<2x128xf32>
    %c2_i32 = arith.constant 2 : i32
    %140 = vector.broadcast %c2_i32 : i32 to vector<2x128xi32>
    %141 = arith.cmpi eq, %5, %140 : vector<2x128xi32>
    %142 = arith.extui %141 : vector<2x128xi1> to vector<2x128xi32>
    %143 = arith.sitofp %142 : vector<2x128xi32> to vector<2x128xf32>
    %c2_86 = arith.constant 2 : index
    %c0_87 = arith.constant 0 : index
    %c0_88 = arith.constant 0 : index
    %144 = vector.load %arg6[%c2_86, %c0_87, %c0_88] : memref<4x8x128xf32, #tpu.memory_space<vmem>>, vector<1x8x128xf32>
    %145 = vector.shape_cast %144 : vector<1x8x128xf32> to vector<8x128xf32>
    %146 = arith.mulf %143, %139 : vector<2x128xf32>
    %cst_89 = arith.constant dense<0.000000e+00> : vector<128xf32>
    %147 = vector.multi_reduction <add>, %146, %cst_89 [0] : vector<2x128xf32> to vector<128xf32>
    %148 = vector.shape_cast %147 : vector<128xf32> to vector<1x128xf32>
    %149 = tpu.iota {dimensions = array<i32: 0>} : vector<8x128xi32>
    %c0_i32_90 = arith.constant 0 : i32
    %150 = vector.broadcast %c0_i32_90 : i32 to vector<8x128xi32>
    %151 = arith.cmpi eq, %149, %150 : vector<8x128xi32>
    %cst_91 = arith.constant 0.000000e+00 : f32
    %152 = vector.shape_cast %148 : vector<1x128xf32> to vector<1x128xf32>
    %153 = vector.broadcast %152 : vector<1x128xf32> to vector<8x128xf32>
    %154 = vector.broadcast %cst_91 : f32 to vector<8x128xf32>
    %155 = arith.select %151, %153, %154 : vector<8x128xi1>, vector<8x128xf32>
    %156 = arith.addf %145, %155 : vector<8x128xf32>
    %c2_92 = arith.constant 2 : index
    %c0_93 = arith.constant 0 : index
    %c0_94 = arith.constant 0 : index
    %157 = vector.load %arg6[%c2_92, %c0_93, %c0_94] : memref<4x8x128xf32, #tpu.memory_space<vmem>>, vector<1x8x128xf32>
    %158 = vector.shape_cast %157 : vector<1x8x128xf32> to vector<8x128xf32>
    %159 = vector.shape_cast %156 : vector<8x128xf32> to vector<1x8x128xf32>
    tpu.vector_store %arg6[%c2_92, %c0_93, %c0_94], %159 {strides = array<i32>} : memref<4x8x128xf32, #tpu.memory_space<vmem>>, vector<1x8x128xf32>,
    %c2_95 = arith.constant 2 : index
    %c0_96 = arith.constant 0 : index
    %c0_97 = arith.constant 0 : index
    %160 = vector.load %arg7[%c2_95, %c0_96, %c0_97] : memref<4x8x128xf32, #tpu.memory_space<vmem>>, vector<1x8x128xf32>
    %161 = vector.shape_cast %160 : vector<1x8x128xf32> to vector<8x128xf32>
    %cst_98 = arith.constant dense<0.000000e+00> : vector<128xf32>
    %162 = vector.multi_reduction <add>, %139, %cst_98 [0] : vector<2x128xf32> to vector<128xf32>
    %163 = vector.shape_cast %162 : vector<128xf32> to vector<1x128xf32>
    %164 = tpu.iota {dimensions = array<i32: 0>} : vector<8x128xi32>
    %c0_i32_99 = arith.constant 0 : i32
    %165 = vector.broadcast %c0_i32_99 : i32 to vector<8x128xi32>
    %166 = arith.cmpi eq, %164, %165 : vector<8x128xi32>
    %cst_100 = arith.constant 0.000000e+00 : f32
    %167 = vector.shape_cast %163 : vector<1x128xf32> to vector<1x128xf32>
    %168 = vector.broadcast %167 : vector<1x128xf32> to vector<8x128xf32>
    %169 = vector.broadcast %cst_100 : f32 to vector<8x128xf32>
    %170 = arith.select %166, %168, %169 : vector<8x128xi1>, vector<8x128xf32>
    %171 = arith.addf %161, %170 : vector<8x128xf32>
    %c2_101 = arith.constant 2 : index
    %c0_102 = arith.constant 0 : index
    %c0_103 = arith.constant 0 : index
    %172 = vector.load %arg7[%c2_101, %c0_102, %c0_103] : memref<4x8x128xf32, #tpu.memory_space<vmem>>, vector<1x8x128xf32>
    %173 = vector.shape_cast %172 : vector<1x8x128xf32> to vector<8x128xf32>
    %174 = vector.shape_cast %171 : vector<8x128xf32> to vector<1x8x128xf32>
    tpu.vector_store %arg7[%c2_101, %c0_102, %c0_103], %174 {strides = array<i32>} : memref<4x8x128xf32, #tpu.memory_space<vmem>>, vector<1x8x128xf32>,
    %c2_104 = arith.constant 2 : index
    %c0_105 = arith.constant 0 : index
    %c0_106 = arith.constant 0 : index
    %175 = vector.load %arg8[%c2_104, %c0_105, %c0_106] : memref<4x8x128xf32, #tpu.memory_space<vmem>>, vector<1x8x128xf32>
    %176 = vector.shape_cast %175 : vector<1x8x128xf32> to vector<8x128xf32>
    %cst_107 = arith.constant dense<0.000000e+00> : vector<128xf32>
    %177 = vector.multi_reduction <add>, %143, %cst_107 [0] : vector<2x128xf32> to vector<128xf32>
    %178 = vector.shape_cast %177 : vector<128xf32> to vector<1x128xf32>
    %179 = tpu.iota {dimensions = array<i32: 0>} : vector<8x128xi32>
    %c0_i32_108 = arith.constant 0 : i32
    %180 = vector.broadcast %c0_i32_108 : i32 to vector<8x128xi32>
    %181 = arith.cmpi eq, %179, %180 : vector<8x128xi32>
    %cst_109 = arith.constant 0.000000e+00 : f32
    %182 = vector.shape_cast %178 : vector<1x128xf32> to vector<1x128xf32>
    %183 = vector.broadcast %182 : vector<1x128xf32> to vector<8x128xf32>
    %184 = vector.broadcast %cst_109 : f32 to vector<8x128xf32>
    %185 = arith.select %181, %183, %184 : vector<8x128xi1>, vector<8x128xf32>
    %186 = arith.addf %176, %185 : vector<8x128xf32>
    %c2_110 = arith.constant 2 : index
    %c0_111 = arith.constant 0 : index
    %c0_112 = arith.constant 0 : index
    %187 = vector.load %arg8[%c2_110, %c0_111, %c0_112] : memref<4x8x128xf32, #tpu.memory_space<vmem>>, vector<1x8x128xf32>
    %188 = vector.shape_cast %187 : vector<1x8x128xf32> to vector<8x128xf32>
    %189 = vector.shape_cast %186 : vector<8x128xf32> to vector<1x8x128xf32>
    tpu.vector_store %arg8[%c2_110, %c0_111, %c0_112], %189 {strides = array<i32>} : memref<4x8x128xf32, #tpu.memory_space<vmem>>, vector<1x8x128xf32>,
    %190 = arith.mulf %32, %36 : vector<2x128xf32>
    %c3_i32 = arith.constant 3 : i32
    %191 = vector.broadcast %c3_i32 : i32 to vector<2x128xi32>
    %192 = arith.cmpi eq, %5, %191 : vector<2x128xi32>
    %193 = arith.extui %192 : vector<2x128xi1> to vector<2x128xi32>
    %194 = arith.sitofp %193 : vector<2x128xi32> to vector<2x128xf32>
    %c3_113 = arith.constant 3 : index
    %c0_114 = arith.constant 0 : index
    %c0_115 = arith.constant 0 : index
    %195 = vector.load %arg6[%c3_113, %c0_114, %c0_115] : memref<4x8x128xf32, #tpu.memory_space<vmem>>, vector<1x8x128xf32>
    %196 = vector.shape_cast %195 : vector<1x8x128xf32> to vector<8x128xf32>
    %197 = arith.mulf %194, %190 : vector<2x128xf32>
    %cst_116 = arith.constant dense<0.000000e+00> : vector<128xf32>
    %198 = vector.multi_reduction <add>, %197, %cst_116 [0] : vector<2x128xf32> to vector<128xf32>
    %199 = vector.shape_cast %198 : vector<128xf32> to vector<1x128xf32>
    %200 = tpu.iota {dimensions = array<i32: 0>} : vector<8x128xi32>
    %c0_i32_117 = arith.constant 0 : i32
    %201 = vector.broadcast %c0_i32_117 : i32 to vector<8x128xi32>
    %202 = arith.cmpi eq, %200, %201 : vector<8x128xi32>
    %cst_118 = arith.constant 0.000000e+00 : f32
    %203 = vector.shape_cast %199 : vector<1x128xf32> to vector<1x128xf32>
    %204 = vector.broadcast %203 : vector<1x128xf32> to vector<8x128xf32>
    %205 = vector.broadcast %cst_118 : f32 to vector<8x128xf32>
    %206 = arith.select %202, %204, %205 : vector<8x128xi1>, vector<8x128xf32>
    %207 = arith.addf %196, %206 : vector<8x128xf32>
    %c3_119 = arith.constant 3 : index
    %c0_120 = arith.constant 0 : index
    %c0_121 = arith.constant 0 : index
    %208 = vector.load %arg6[%c3_119, %c0_120, %c0_121] : memref<4x8x128xf32, #tpu.memory_space<vmem>>, vector<1x8x128xf32>
    %209 = vector.shape_cast %208 : vector<1x8x128xf32> to vector<8x128xf32>
    %210 = vector.shape_cast %207 : vector<8x128xf32> to vector<1x8x128xf32>
    tpu.vector_store %arg6[%c3_119, %c0_120, %c0_121], %210 {strides = array<i32>} : memref<4x8x128xf32, #tpu.memory_space<vmem>>, vector<1x8x128xf32>,
    %c3_122 = arith.constant 3 : index
    %c0_123 = arith.constant 0 : index
    %c0_124 = arith.constant 0 : index
    %211 = vector.load %arg7[%c3_122, %c0_123, %c0_124] : memref<4x8x128xf32, #tpu.memory_space<vmem>>, vector<1x8x128xf32>
    %212 = vector.shape_cast %211 : vector<1x8x128xf32> to vector<8x128xf32>
    %cst_125 = arith.constant dense<0.000000e+00> : vector<128xf32>
    %213 = vector.multi_reduction <add>, %190, %cst_125 [0] : vector<2x128xf32> to vector<128xf32>
    %214 = vector.shape_cast %213 : vector<128xf32> to vector<1x128xf32>
    %215 = tpu.iota {dimensions = array<i32: 0>} : vector<8x128xi32>
    %c0_i32_126 = arith.constant 0 : i32
    %216 = vector.broadcast %c0_i32_126 : i32 to vector<8x128xi32>
    %217 = arith.cmpi eq, %215, %216 : vector<8x128xi32>
    %cst_127 = arith.constant 0.000000e+00 : f32
    %218 = vector.shape_cast %214 : vector<1x128xf32> to vector<1x128xf32>
    %219 = vector.broadcast %218 : vector<1x128xf32> to vector<8x128xf32>
    %220 = vector.broadcast %cst_127 : f32 to vector<8x128xf32>
    %221 = arith.select %217, %219, %220 : vector<8x128xi1>, vector<8x128xf32>
    %222 = arith.addf %212, %221 : vector<8x128xf32>
    %c3_128 = arith.constant 3 : index
    %c0_129 = arith.constant 0 : index
    %c0_130 = arith.constant 0 : index
    %223 = vector.load %arg7[%c3_128, %c0_129, %c0_130] : memref<4x8x128xf32, #tpu.memory_space<vmem>>, vector<1x8x128xf32>
    %224 = vector.shape_cast %223 : vector<1x8x128xf32> to vector<8x128xf32>
    %225 = vector.shape_cast %222 : vector<8x128xf32> to vector<1x8x128xf32>
    tpu.vector_store %arg7[%c3_128, %c0_129, %c0_130], %225 {strides = array<i32>} : memref<4x8x128xf32, #tpu.memory_space<vmem>>, vector<1x8x128xf32>,
    %c3_131 = arith.constant 3 : index
    %c0_132 = arith.constant 0 : index
    %c0_133 = arith.constant 0 : index
    %226 = vector.load %arg8[%c3_131, %c0_132, %c0_133] : memref<4x8x128xf32, #tpu.memory_space<vmem>>, vector<1x8x128xf32>
    %227 = vector.shape_cast %226 : vector<1x8x128xf32> to vector<8x128xf32>
    %cst_134 = arith.constant dense<0.000000e+00> : vector<128xf32>
    %228 = vector.multi_reduction <add>, %194, %cst_134 [0] : vector<2x128xf32> to vector<128xf32>
    %229 = vector.shape_cast %228 : vector<128xf32> to vector<1x128xf32>
    %230 = tpu.iota {dimensions = array<i32: 0>} : vector<8x128xi32>
    %c0_i32_135 = arith.constant 0 : i32
    %231 = vector.broadcast %c0_i32_135 : i32 to vector<8x128xi32>
    %232 = arith.cmpi eq, %230, %231 : vector<8x128xi32>
    %cst_136 = arith.constant 0.000000e+00 : f32
    %233 = vector.shape_cast %229 : vector<1x128xf32> to vector<1x128xf32>
    %234 = vector.broadcast %233 : vector<1x128xf32> to vector<8x128xf32>
    %235 = vector.broadcast %cst_136 : f32 to vector<8x128xf32>
    %236 = arith.select %232, %234, %235 : vector<8x128xi1>, vector<8x128xf32>
    %237 = arith.addf %227, %236 : vector<8x128xf32>
    %c3_137 = arith.constant 3 : index
    %c0_138 = arith.constant 0 : index
    %c0_139 = arith.constant 0 : index
    %238 = vector.load %arg8[%c3_137, %c0_138, %c0_139] : memref<4x8x128xf32, #tpu.memory_space<vmem>>, vector<1x8x128xf32>
    %239 = vector.shape_cast %238 : vector<1x8x128xf32> to vector<8x128xf32>
    %240 = vector.shape_cast %237 : vector<8x128xf32> to vector<1x8x128xf32>
    tpu.vector_store %arg8[%c3_137, %c0_138, %c0_139], %240 {strides = array<i32>} : memref<4x8x128xf32, #tpu.memory_space<vmem>>, vector<1x8x128xf32>,
    %c0_i32_140 = arith.constant 0 : i32
    %241 = arith.cmpi eq, %arg2, %c0_i32_140 : i32
    %242 = arith.extui %241 : i1 to i32
    %c0_i32_141 = arith.constant 0 : i32
    %243 = arith.cmpi ne, %242, %c0_i32_141 : i32
    scf.if %243 {
      %c0_142 = arith.constant 0 : index
      %c0_143 = arith.constant 0 : index
      %c0_144 = arith.constant 0 : index
      %244 = vector.load %arg6[%c0_142, %c0_143, %c0_144] : memref<4x8x128xf32, #tpu.memory_space<vmem>>, vector<4x8x128xf32>
      %c0_145 = arith.constant 0 : index
      %c0_146 = arith.constant 0 : index
      %c0_147 = arith.constant 0 : index
      %c0_148 = arith.constant 0 : index
      %c0_149 = arith.constant 0 : index
      %245 = vector.load %arg5[%c0_145, %c0_146, %c0_147, %c0_148, %c0_149] : memref<1x1x12x8x128xf32, #tpu.memory_space<vmem>>, vector<1x1x4x8x128xf32>
      %246 = vector.shape_cast %245 : vector<1x1x4x8x128xf32> to vector<4x8x128xf32>
      %247 = vector.shape_cast %244 : vector<4x8x128xf32> to vector<1x1x4x8x128xf32>
      tpu.vector_store %arg5[%c0_145, %c0_146, %c0_147, %c0_148, %c0_149], %247 {strides = array<i32>} : memref<1x1x12x8x128xf32, #tpu.memory_space<vmem>>, vector<1x1x4x8x128xf32>,
      %c0_150 = arith.constant 0 : index
      %c0_151 = arith.constant 0 : index
      %c0_152 = arith.constant 0 : index
      %248 = vector.load %arg7[%c0_150, %c0_151, %c0_152] : memref<4x8x128xf32, #tpu.memory_space<vmem>>, vector<4x8x128xf32>
      %c0_153 = arith.constant 0 : index
      %c0_154 = arith.constant 0 : index
      %c4 = arith.constant 4 : index
      %c0_155 = arith.constant 0 : index
      %c0_156 = arith.constant 0 : index
      %249 = vector.load %arg5[%c0_153, %c0_154, %c4, %c0_155, %c0_156] : memref<1x1x12x8x128xf32, #tpu.memory_space<vmem>>, vector<1x1x4x8x128xf32>
      %250 = vector.shape_cast %249 : vector<1x1x4x8x128xf32> to vector<4x8x128xf32>
      %251 = vector.shape_cast %248 : vector<4x8x128xf32> to vector<1x1x4x8x128xf32>
      tpu.vector_store %arg5[%c0_153, %c0_154, %c4, %c0_155, %c0_156], %251 {strides = array<i32>} : memref<1x1x12x8x128xf32, #tpu.memory_space<vmem>>, vector<1x1x4x8x128xf32>,
      %c0_157 = arith.constant 0 : index
      %c0_158 = arith.constant 0 : index
      %c0_159 = arith.constant 0 : index
      %252 = vector.load %arg8[%c0_157, %c0_158, %c0_159] : memref<4x8x128xf32, #tpu.memory_space<vmem>>, vector<4x8x128xf32>
      %c0_160 = arith.constant 0 : index
      %c0_161 = arith.constant 0 : index
      %c8 = arith.constant 8 : index
      %c0_162 = arith.constant 0 : index
      %c0_163 = arith.constant 0 : index
      %253 = vector.load %arg5[%c0_160, %c0_161, %c8, %c0_162, %c0_163] : memref<1x1x12x8x128xf32, #tpu.memory_space<vmem>>, vector<1x1x4x8x128xf32>
      %254 = vector.shape_cast %253 : vector<1x1x4x8x128xf32> to vector<4x8x128xf32>
      %255 = vector.shape_cast %252 : vector<4x8x128xf32> to vector<1x1x4x8x128xf32>
      tpu.vector_store %arg5[%c0_160, %c0_161, %c8, %c0_162, %c0_163], %255 {strides = array<i32>} : memref<1x1x12x8x128xf32, #tpu.memory_space<vmem>>, vector<1x1x4x8x128xf32>,
    } else {
    }
    return
  }
  func.func @transform_0(%arg0: i32, %arg1: i32, %arg2: i32) -> (i32, i32, i32) {
    %c1_i32 = arith.constant 1 : i32
    %0 = arith.muli %arg1, %c1_i32 : i32
    %1 = arith.addi %0, %arg2 : i32
    %c0_i32 = arith.constant 0 : i32
    %c0_i32_0 = arith.constant 0 : i32
    return %arg0, %1, %c0_i32 : i32, i32, i32
  }
  func.func @transform_1(%arg0: i32, %arg1: i32, %arg2: i32) -> (i32, i32, i32, i32) {
    %c1_i32 = arith.constant 1 : i32
    %0 = arith.muli %arg1, %c1_i32 : i32
    %1 = arith.addi %0, %arg2 : i32
    %c0_i32 = arith.constant 0 : i32
    %c0_i32_0 = arith.constant 0 : i32
    %c0_i32_1 = arith.constant 0 : i32
    return %arg0, %c0_i32, %1, %c0_i32_0 : i32, i32, i32, i32
  }
  func.func @transform_2(%arg0: i32, %arg1: i32, %arg2: i32) -> (i32, i32, i32, i32, i32) {
    %c0_i32 = arith.constant 0 : i32
    %c0_i32_0 = arith.constant 0 : i32
    %c0_i32_1 = arith.constant 0 : i32
    %c0_i32_2 = arith.constant 0 : i32
    return %arg0, %arg1, %c0_i32, %c0_i32_0, %c0_i32_1 : i32, i32, i32, i32, i32
  }
}

</mosaic_0001>

<bundles_post_ra>
// kernel: tpu_custom_call.1
= control target key start
LH: loop header
LB: loop body
LE: loop exit
PB: predicated region body
PF: predicated region fallthrough
CT: control target
= control target key end

     0   :  { %7 = vsyncpa [#allocation6], 0  ;;  %s1179_s0 = inlined_call_operand.hbm [shape: s8[2,2,128], index: 0, kind: input, shape index: {}]   ;;  %s1180_s1 = inlined_call_operand.hbm [shape: f32[2,4,2,128], index: 1, kind: input, shape index: {}]   ;;  %s1181_s2 = inlined_call_operand.hbm [shape: f32[2,1,12,8,128], index: 2, kind: output, shape index: {}]  }
   0x1   :  { %9 = vsyncpa [#allocation6 + $0x1], 0 }
   0x2   :  { %10 = vsyncpa [#allocation9], 0 }
   0x3   :  { %12 = vsyncpa [#allocation9 + $0x1], 0 }
   0x4   :  { %13 = vsyncpa [#allocation7], 0 }
   0x5   :  { %15 = vsyncpa [#allocation7 + $0x1], 0  ;;  %s881_s9 = smov 0   ;;  %s883_s10 = smov 0  }
   0x6   :  { %s885_s11 = smov 0   ;;  %s887_s12 = smov 0  }
   0x7   :  { %s889_s13 = smov 0   ;;  %s891_s14 = smov 0  }
   0x8 LB: > { %s597_s15 = sadd.s32 4294967295, %s856_s14   ;;  %s598_s16 = sadd.s32 4294967294, %s856_s14   ;;  %s856_s14 = sphi %s891_s14, %s21_s14   ;;  %s852_s13 = sphi %s889_s13, %s1200_s13   ;;  %s848_s12 = sphi %s887_s12, %s1199_s12   ;;  %s844_s11 = sphi %s885_s11, %s1198_s11   ;;  %s840_s10 = sphi %s883_s10, %s1197_s10   ;;  %s836_s9 = sphi %s881_s9, %s1196_s9  }
   0x9   : > { %s40_s17 = sadd.s32 1, %s852_s13  ;;  %s51_s18 = sadd.s32 1, %s844_s11 }
   0xa   : > { %p42_p0 = scmp.ge.s32.totalorder %s40_s17, 2  ;;  %p58_p1 = scmp.ne.s32.totalorder %s844_s11, %s840_s10 }
   0xb   : > { %p59_p2 = scmp.eq.s32.totalorder %s856_s14, 0  ;;  %p64_p3 = scmp.ne.s32.totalorder %s840_s10, %s836_s9 }
   0xc   : > { %s1202_s17 = smov (%p42_p0, %s40_s17), 0  ;;  %p65_p5 = scmp.eq.s32.totalorder %s597_s15, 0 }
   0xd   : > { %p922_p4 = por %p59_p2, %p58_p1  ;;  %s46_s20 = ssub.s32 %s852_s13, %s1202_s17 }
   0xe   : > { %p120_p6 = scmp.eq.s32.totalorder %s597_s15, 1  ;;  %p49_p7 = scmp.eq.s32.totalorder %s46_s20, 0 }
   0xf   : > { %p928_p8 = por %p65_p5, %p64_p3  ;;  %p126_p10 = scmp.eq.s32.totalorder %s598_s16, 1 }
  0x10   : > { %p932_p9 = por %p120_p6, %p58_p1  ;;  %p645_p13 = scmp.lt.s32.totalorder %s856_s14, 2 }
  0x11   : > { %s1185_s21 = scalar_select %p928_p8, 1, 0 }
  0x12   : > { %s1186_s22 = scalar_select %p932_p9, 1, 0 }
  0x13   : > { %s937_s23 = scalar_select %p49_p7, %s844_s11, %s51_s18  }
  0x14   : > { %p939_p11 = por %p126_p10, %p64_p3  ;;  %s946_s25 = sand.u32 1, %s844_s11  }
  0x15   : > { %s601_s26 = sshll.u32 %s852_s13, 4  ;;  %s149_s27 = scalar_lea.vmem [#allocation5], %s946_s25 }
  0x16   : > { %s1187_s24 = scalar_select %p939_p11, 1, 0 }
  0x17   : > { %s158_s28 = sshll.u32 %s149_s27, 4  ;;  %s953_s3 = scalar_lea.hbm %s1179_s0, %s601_s26  ;;  %s955_s28 = int_to_ptr.vmem [resolvable:$true] %s158_s28 }
  0x18   : > { %p959_p0 = pnand %p645_p13, %p922_p4  ;;  %s602_s5 = sshll.u32 %s946_s25, 3 }
  0x19   : > { %s147_s6 = scalar_lea.sflag [#allocation6], %s946_s25  ;;  %s710_s7 = scalar_lea.hbm %s953_s3, 16 }
  0x1a   : > { %p711_p3 = scmp.ne.s32.totalorder %s953_s3, %s710_s7  ;;  %p712_p5 = pneg %p959_p0 }
  0x1b   : > { %s715_s16 = scalar_lea.hbm %s1179_s0, 32  ;;  %p716_p4 = scmp.lt.u32.totalorder %s953_s3, %s1179_s0 }
  0x1c   : > { %p713_p6 = pnand %p712_p5, %p711_p3  ;;  %p717_p10 = scmp.lt.u32.totalorder %s715_s16, %s710_s7 }
  0x1d   : > { %p719_p12 = scmp.lt.u32.totalorder %s710_s7, %s953_s3 }
  0x1e   : > { %p714_p7 = pneg %p713_p6  ;;  %p718_p13 = por %p717_p10, %p716_p4 }
  0x20   : > { %p720_p1 = por %p719_p12, %p718_p13 }
  0x22   : > { %p721_p2 = pnand %p720_p1, %p714_p7 }
  0x24   : > { %724 = shalt.err (!%p721_p2)
}
  0x25   : > { %s725_s20 = scalar_lea.vmem %s955_s28, 16  ;;  %s858_s26 = smov [#allocation5]  }
  0x26   : > { %p726_p3 = scmp.ne.s32.totalorder %s955_s28, %s725_s20  ;;  %s730_s27 = sshll.u32 %s858_s26, 4  ;;  %s731_s27 = int_to_ptr.vmem [resolvable:$false] %s730_s27 }
  0x27   : > { %s732_s29 = scalar_lea.vmem %s731_s27, 32  ;;  %p733_p9 = scmp.lt.s32.totalorder %s955_s28, %s731_s27 }
  0x28   : > { %p728_p6 = pnand %p726_p3, %p712_p5  ;;  %p734_p4 = scmp.lt.s32.totalorder %s732_s29, %s725_s20 }
  0x2a   : > { %p729_p11 = pneg %p728_p6  ;;  %p735_p10 = por %p734_p4, %p733_p9 }
  0x2c   : > { %p736_p12 = pnand %p735_p10, %p729_p11 }
  0x2e   : > { %739 = shalt.err (!%p736_p12)
}
  0x2f   : > { %637 = dma.hbm_to_vmem [thread:$0]  (!%p959_p0), %s953_s3, 16, %s955_s28, %s147_s6  }
  0x30   : > { %p1189_p1 = scmp.lt.s32.totalorder %s856_s14, 3  ;;  %p1190_p2 = scmp.ge.s32.totalorder %s856_s14, 1 }
  0x31   : > { %s625_s7 = sshll.u32 %s852_s13, 7  ;;  %s169_s8 = scalar_lea.vmem [#allocation8], %s602_s5 }
  0x32   : > { %p996_p7 = pnand %p1190_p2, %p1189_p1  ;;  %s178_s15 = sshll.u32 %s169_s8, 4  ;;  %s1008_s15 = int_to_ptr.vmem [resolvable:$true] %s178_s15 }
  0x33   : > { %s1006_s19 = scalar_lea.hbm %s1180_s1, %s625_s7  ;;  %s166_s28 = scalar_lea.sflag [#allocation9], %s946_s25 }
  0x34   : > { %s740_s3 = scalar_lea.hbm %s1006_s19, 128  ;;  %s745_s20 = scalar_lea.hbm %s1180_s1, 256 }
  0x35   : > { %p741_p9 = scmp.ne.s32.totalorder %s1006_s19, %s740_s3  ;;  %p746_p3 = scmp.lt.u32.totalorder %s1006_s19, %s1180_s1 }
  0x36   : > { %p747_p6 = scmp.lt.u32.totalorder %s745_s20, %s740_s3  ;;  %p749_p10 = scmp.lt.u32.totalorder %s740_s3, %s1006_s19 }
  0x37   : > { %p743_p11 = pnand %p741_p9, %p712_p5 }
  0x38   : > { %p748_p4 = por %p747_p6, %p746_p3 }
  0x39   : > { %p744_p13 = pneg %p743_p11 }
  0x3a   : > { %p750_p12 = por %p749_p10, %p748_p4 }
  0x3c   : > { %p751_p1 = pnand %p750_p12, %p744_p13 }
  0x3e   : > { %754 = shalt.err (!%p751_p1)
}
  0x3f   : > { %s755_s29 = scalar_lea.vmem %s1008_s15, 128  ;;  %s859_s7 = smov [#allocation8]  }
  0x40   : > { %p756_p2 = scmp.ne.s32.totalorder %s1008_s15, %s755_s29  ;;  %s760_s8 = sshll.u32 %s859_s7, 4  ;;  %s761_s8 = int_to_ptr.vmem [resolvable:$false] %s760_s8 }
  0x41   : > { %s762_s16 = scalar_lea.vmem %s761_s8, 256  ;;  %p763_p8 = scmp.lt.s32.totalorder %s1008_s15, %s761_s8 }
  0x42   : > { %p758_p9 = pnand %p756_p2, %p712_p5  ;;  %p764_p3 = scmp.lt.s32.totalorder %s762_s16, %s755_s29 }
  0x44   : > { %p759_p11 = pneg %p758_p9  ;;  %p765_p6 = por %p764_p3, %p763_p8 }
  0x46   : > { %p766_p4 = pnand %p765_p6, %p759_p11 }
  0x48   : > { %769 = shalt.err (!%p766_p4)
}
  0x49   : > { %s860_s18 = smov 32   ;;  %s861_s3 = smov 2  }
  0x4a   : > { %640 = dma.hbm_to_vmem [thread:$0]  (!%p959_p0), %s1006_s19, 128, %s1008_s15, %s166_s28, %s860_s18, %s860_s18, %s861_s3  }
  0x4b   : > { %190 = sbr.rel (%p996_p7) target bundleno = 163 (0xa3), region = 28  ;;  %s1039_s5 = sand.u32 (!%p996_p7), 1, %s840_s10  }
  0x4c   : > { %s193_s6 = scalar_lea.sflag (!%p996_p7), [#allocation6], %s1039_s5  ;;  %s195_s20 = scalar_lea.vmem (!%p996_p7), [#allocation5], %s1039_s5 }
  0x4d   : > { %p1192_p8 = scmp.ne.s32.totalorder (!%p996_p7), %s1185_s21, 0 }
  0x52   : > { %823 = dma.done.wait (%p1192_p8), %s193_s6, 16  }
  0x53   : > { %825 = vsyncadd (%p1192_p8), %s193_s6, 4294967280  ;;  %s606_s25 = sshll.u32 %s1039_s5, 3  ;;  %s201_s4 = scalar_lea.sflag [#allocation9], %s1039_s5 }
  0x54   : > { %s204_s30 = scalar_lea.vmem [#allocation8], %s606_s25 }
  0x55   : > { %827 = dma.done.wait (%p1192_p8), %s201_s4, 128  }
  0x56   : > { %829 = vsyncadd (%p1192_p8), %s201_s4, 4294967168  ;;  %v247_v0 = vld [vmem:[%s195_s20] sm:$0x1]  ;;  %v249_v1 = vld [vmem:[%s204_s30] sm:$0x3]  ;;  %vm281_vm0 = vcmask 1041408   ;;  %v289_v7 = vlaneseq }
  0x57   : > { %v607_v2 = vld [vmem:[%s204_s30 + $0x2] sm:$0x3]  ;;  %v248_v3 = vunpack.c.0.s8 %v247_v0  ;;  %v608_v5 = vld [vmem:[%s204_s30 + $0x4] sm:$0x3]  ;;  %v609_v6 = vld [vmem:[%s204_s30 + $0x6] sm:$0x3] }
  0x58   : > { %v252_v4 = vmax.f32 %v249_v1, %v607_v2  ;;  %v862_v9 = vmov 0.0   ;;  %v1069_v36 = vshrl.u32 %v289_v7, 7  ;;  %s626_s21 = smul.u32 96, %s1039_s5  ;;  %s470_s29 = scalar_lea.sflag [#allocation7], %s1039_s5 }
  0x59   : > { %vm276_vm1 = vcmp.eq.s32.totalorder %v248_v3, 0  ;;  %vm318_vm2 = vcmp.eq.s32.totalorder %v248_v3, 1  ;;  %vm359_vm3 = vcmp.eq.s32.totalorder %v248_v3, 2  ;;  %vm400_vm4 = vcmp.eq.s32.totalorder %v248_v3, 3  ;;  %s627_s19 = smul.u32 1536, %s848_s12  ;;  %p1193_p5 = scmp.ne.s32.totalorder %s1186_s22, 0 }
  0x5a   : > { %v255_v8 = vmax.f32 %v252_v4, %v608_v5  ;;  %v1053_v10 = vsel %vm276_vm1, 1.0, %v862_v9  ;;  %v1055_v11 = vsel %vm318_vm2, 1.0, %v862_v9  ;;  %v1057_v12 = vsel %vm359_vm3, 1.0, %v862_v9  ;;  %s1077_s15 = scalar_lea.vmem [#allocation10], %s626_s21  ;;  %s863_s8 = smov [#allocation10]  }
  0x5b   : > { %v1059_v14 = vsel %vm400_vm4, 1.0, %v862_v9  ;;  %v307_v15 = vsel %vm281_vm0, %v1053_v10, 0.0  ;;  %v348_v16 = vsel %vm281_vm0, %v1055_v11, 0.0  ;;  %v389_v19 = vsel %vm281_vm0, %v1057_v12, 0.0  ;;  %s485_s28 = sshll.u32 %s1077_s15, 4  ;;  %s1112_s27 = scalar_lea.hbm %s1181_s2, %s627_s19  ;;  %s1114_s28 = int_to_ptr.vmem [resolvable:$true] %s485_s28 }
  0x5c   : > { %v258_v13 = vmax.f32 %v255_v8, %v609_v6  ;;  %v308_v17 = vrot.slane %v307_v15, 4  ;;  %v349_v18 = vrot.slane %v348_v16, 4  ;;  %v430_v20 = vsel %vm281_vm0, %v1059_v14, 0.0  ;;  %s770_s7 = scalar_lea.vmem %s1114_s28, 1536  ;;  %s774_s16 = sshll.u32 %s863_s8, 4  ;;  %s775_s16 = int_to_ptr.vmem [resolvable:$false] %s774_s16 }
  0x5d   : > { %v390_v27 = vrot.slane %v389_v19, 4  ;;  %v431_v28 = vrot.slane %v430_v20, 4  ;;  %vm291_vm5 = vcmp.eq.s32.totalorder %v1069_v36, 0  ;;  %p771_p0 = scmp.ne.s32.totalorder %s1114_s28, %s770_s7  ;;  %s776_s18 = scalar_lea.vmem %s775_s16, 3072 }
  0x5e   : > { %v259_v21 = vsub.f32 %v249_v1, %v258_v13  ;;  %v262_v22 = vsub.f32 %v607_v2, %v258_v13  ;;  %v265_v23 = vsub.f32 %v608_v5, %v258_v13  ;;  %v268_v24 = vsub.f32 %v609_v6, %v258_v13  ;;  %p777_p10 = scmp.lt.s32.totalorder %s1114_s28, %s775_s16  ;;  %p778_p12 = scmp.lt.s32.totalorder %s776_s18, %s770_s7 }
  0x5f   : > { %v309_v25 = vadd.f32 %v308_v17, %v307_v15  ;;  %v350_v26 = vadd.f32 %v349_v18, %v348_v16  ;;  %v391_v35 = vadd.f32 %v390_v27, %v389_v19  ;;  %v432_v37 = vadd.f32 %v431_v28, %v430_v20  ;;  %p772_p7 = pnand %p771_p0, %p1193_p5 }
  0x60   : > { %v260_v29 = vmul.f32 1.442695, %v259_v21  ;;  %v263_v30 = vmul.f32 1.442695, %v262_v22  ;;  %v266_v31 = vmul.f32 1.442695, %v265_v23  ;;  %p779_p1 = por %p778_p12, %p777_p10 }
  0x61   : > { %v269_v32 = vmul.f32 1.442695, %v268_v24  ;;  %v310_v33 = vrot.slane %v309_v25, 2  ;;  %v351_v34 = vrot.slane %v350_v26, 2  ;;  %v392_v40 = vrot.slane %v391_v35, 2  ;;  %p773_p13 = pneg %p772_p7 }
  0x62   : > { %700 = vpow2.f32 %v260_v29  ;;  %v433_v41 = vrot.slane %v432_v37, 2 }
  0x63   : > { %702 = vpow2.f32 %v263_v30  ;;  %v311_v38 = vadd.f32 %v310_v33, %v309_v25  ;;  %v352_v39 = vadd.f32 %v351_v34, %v350_v26  ;;  %v393_v44 = vadd.f32 %v392_v40, %v391_v35  ;;  %p780_p2 = pnand %p779_p1, %p773_p13 }
  0x64   : > { %704 = vpow2.f32 %v266_v31  ;;  %v434_v45 = vadd.f32 %v433_v41, %v432_v37 }
  0x65   : > { %706 = vpow2.f32 %v269_v32  ;;  %v312_v42 = vrot.slane %v311_v38, 1  ;;  %v353_v43 = vrot.slane %v352_v39, 1  ;;  %v394_v48 = vrot.slane %v393_v44, 1 }
  0x66   : > { %v435_v49 = vrot.slane %v434_v45, 1 }
  0x67   : > { %v313_v46 = vadd.f32 %v312_v42, %v311_v38  ;;  %v354_v47 = vadd.f32 %v353_v43, %v352_v39  ;;  %v395_v52 = vadd.f32 %v394_v48, %v393_v44 }
  0x68   : > { %v436_v53 = vadd.f32 %v435_v49, %v434_v45 }
  0x69   : > { %v314_v50 = vsel %vm291_vm5, %v313_v46, 0.0  ;;  %v355_v51 = vsel %vm291_vm5, %v354_v47, 0.0  ;;  %v396_v54 = vsel %vm291_vm5, %v395_v52, 0.0 }
  0x6a   : > { %618 = vst [vmem:[%s1077_s15 + $0x40] sm:$0xff] %v314_v50  ;;  %619 = vst [vmem:[%s1077_s15 + $0x48] sm:$0xff] %v355_v51  ;;  %v437_v56 = vsel %vm291_vm5, %v436_v53, 0.0 }
  0x6b   : > { %620 = vst [vmem:[%s1077_s15 + $0x50] sm:$0xff] %v396_v54  ;;  %621 = vst [vmem:[%s1077_s15 + $0x58] sm:$0xff] %v437_v56 }
  0x6c   : > { %v701_v55 = vpop.eup %700 }
  0x6d   : > { %v703_v57 = vpop.eup %702 }
  0x6e   : > { %v705_v58 = vpop.eup %704  ;;  %v271_v59 = vadd.f32 %v703_v57, %v701_v55 }
  0x6f   : > { %v707_v60 = vpop.eup %706 }
  0x70   : > { %v272_v61 = vadd.f32 %v705_v58, %v271_v59 }
  0x72   : > { %v273_v62 = vadd.f32 %v707_v60, %v272_v61 }
  0x74   : > { %708 = vrcp.f32 %v273_v62 }
  0x7e   : > { %v709_v63 = vpop.eup %708 }
  0x7f   : > { %v275_v0 = vmul.f32 %v709_v63, %v701_v55  ;;  %v317_v1 = vmul.f32 %v709_v63, %v703_v57  ;;  %v358_v2 = vmul.f32 %v709_v63, %v705_v58  ;;  %v399_v3 = vmul.f32 %v709_v63, %v707_v60 }
  0x81   : > { %v280_v4 = vmul.f32 %v1053_v10, %v275_v0  ;;  %v323_v5 = vmul.f32 %v1055_v11, %v317_v1  ;;  %v364_v6 = vmul.f32 %v1057_v12, %v358_v2  ;;  %v405_v7 = vmul.f32 %v1059_v14, %v399_v3 }
  0x82   : > { %v296_v8 = vsel %vm281_vm0, %v275_v0, 0.0  ;;  %v336_v9 = vsel %vm281_vm0, %v317_v1, 0.0  ;;  %v377_v13 = vsel %vm281_vm0, %v358_v2, 0.0  ;;  %v418_v15 = vsel %vm281_vm0, %v399_v3, 0.0 }
  0x83   : > { %v282_v16 = vsel %vm281_vm0, %v280_v4, 0.0  ;;  %v324_v17 = vsel %vm281_vm0, %v323_v5, 0.0  ;;  %v365_v10 = vsel %vm281_vm0, %v364_v6, 0.0  ;;  %v406_v11 = vsel %vm281_vm0, %v405_v7, 0.0 }
  0x84   : > { %v283_v18 = vrot.slane %v282_v16, 4  ;;  %v325_v12 = vrot.slane %v324_v17, 4  ;;  %v366_v19 = vrot.slane %v365_v10, 4  ;;  %v407_v14 = vrot.slane %v406_v11, 4 }
  0x85   : > { %v297_v20 = vrot.slane %v296_v8, 4  ;;  %v337_v21 = vrot.slane %v336_v9, 4  ;;  %v378_v22 = vrot.slane %v377_v13, 4  ;;  %v419_v23 = vrot.slane %v418_v15, 4 }
  0x86   : > { %v284_v24 = vadd.f32 %v283_v18, %v282_v16  ;;  %v326_v25 = vadd.f32 %v325_v12, %v324_v17  ;;  %v367_v26 = vadd.f32 %v366_v19, %v365_v10  ;;  %v408_v27 = vadd.f32 %v407_v14, %v406_v11 }
  0x87   : > { %v298_v28 = vadd.f32 %v297_v20, %v296_v8  ;;  %v338_v29 = vadd.f32 %v337_v21, %v336_v9  ;;  %v379_v30 = vadd.f32 %v378_v22, %v377_v13  ;;  %v420_v31 = vadd.f32 %v419_v23, %v418_v15 }
  0x88   : > { %v285_v32 = vrot.slane %v284_v24, 2  ;;  %v327_v33 = vrot.slane %v326_v25, 2  ;;  %v368_v34 = vrot.slane %v367_v26, 2  ;;  %v409_v35 = vrot.slane %v408_v27, 2 }
  0x89   : > { %v299_v37 = vrot.slane %v298_v28, 2  ;;  %v339_v38 = vrot.slane %v338_v29, 2  ;;  %v380_v39 = vrot.slane %v379_v30, 2  ;;  %v421_v40 = vrot.slane %v420_v31, 2 }
  0x8a   : > { %v286_v41 = vadd.f32 %v285_v32, %v284_v24  ;;  %v328_v42 = vadd.f32 %v327_v33, %v326_v25  ;;  %v369_v43 = vadd.f32 %v368_v34, %v367_v26  ;;  %v410_v44 = vadd.f32 %v409_v35, %v408_v27 }
  0x8b   : > { %v300_v45 = vadd.f32 %v299_v37, %v298_v28  ;;  %v340_v46 = vadd.f32 %v339_v38, %v338_v29  ;;  %v381_v47 = vadd.f32 %v380_v39, %v379_v30  ;;  %v422_v48 = vadd.f32 %v421_v40, %v420_v31 }
  0x8c   : > { %v287_v49 = vrot.slane %v286_v41, 1  ;;  %v329_v50 = vrot.slane %v328_v42, 1  ;;  %v370_v51 = vrot.slane %v369_v43, 1  ;;  %v411_v52 = vrot.slane %v410_v44, 1 }
  0x8d   : > { %v301_v53 = vrot.slane %v300_v45, 1  ;;  %v341_v54 = vrot.slane %v340_v46, 1  ;;  %v382_v55 = vrot.slane %v381_v47, 1  ;;  %v423_v56 = vrot.slane %v422_v48, 1 }
  0x8e   : > { %v288_v57 = vadd.f32 %v287_v49, %v286_v41  ;;  %v330_v58 = vadd.f32 %v329_v50, %v328_v42  ;;  %v371_v59 = vadd.f32 %v370_v51, %v369_v43  ;;  %v412_v60 = vadd.f32 %v411_v52, %v410_v44 }
  0x8f   : > { %v302_v61 = vadd.f32 %v301_v53, %v300_v45  ;;  %v342_v62 = vadd.f32 %v341_v54, %v340_v46  ;;  %v383_v63 = vadd.f32 %v382_v55, %v381_v47  ;;  %v424_v0 = vadd.f32 %v423_v56, %v422_v48 }
  0x90   : > { %v292_v1 = vsel %vm291_vm5, %v288_v57, 0.0  ;;  %v331_v2 = vsel %vm291_vm5, %v330_v58, 0.0  ;;  %v372_v3 = vsel %vm291_vm5, %v371_v59, 0.0  ;;  %v413_v4 = vsel %vm291_vm5, %v412_v60, 0.0 }
  0x91   : > { %447 = vst [vmem:[%s1077_s15] sm:$0xff] %v292_v1  ;;  %448 = vst [vmem:[%s1077_s15 + $0x8] sm:$0xff] %v331_v2  ;;  %v303_v5 = vsel %vm291_vm5, %v302_v61, 0.0  ;;  %v343_v6 = vsel %vm291_vm5, %v342_v62, 0.0  ;;  %v384_v7 = vsel %vm291_vm5, %v383_v63, 0.0  ;;  %v425_v8 = vsel %vm291_vm5, %v424_v0, 0.0 }
  0x92   : > { %449 = vst [vmem:[%s1077_s15 + $0x10] sm:$0xff] %v372_v3  ;;  %450 = vst [vmem:[%s1077_s15 + $0x18] sm:$0xff] %v413_v4 }
  0x93   : > { %614 = vst [vmem:[%s1077_s15 + $0x20] sm:$0xff] %v303_v5  ;;  %615 = vst [vmem:[%s1077_s15 + $0x28] sm:$0xff] %v343_v6 }
  0x94   : > { %616 = vst [vmem:[%s1077_s15 + $0x30] sm:$0xff] %v384_v7  ;;  %617 = vst [vmem:[%s1077_s15 + $0x38] sm:$0xff] %v425_v8 }
  0x95   : > { %783 = shalt.err (!%p780_p2)
}
  0x96   : > { %s784_s3 = scalar_lea.hbm %s1112_s27, 1536  ;;  %s788_s25 = scalar_lea.hbm %s1181_s2, 3072 }
  0x97   : > { %p785_p9 = scmp.ne.s32.totalorder %s1112_s27, %s784_s3  ;;  %p789_p6 = scmp.lt.u32.totalorder %s1112_s27, %s1181_s2 }
  0x98   : > { %p790_p4 = scmp.lt.u32.totalorder %s788_s25, %s784_s3  ;;  %p792_p0 = scmp.lt.u32.totalorder %s784_s3, %s1112_s27 }
  0x99   : > { %p786_p11 = pnand %p785_p9, %p1193_p5 }
  0x9a   : > { %p791_p8 = por %p790_p4, %p789_p6 }
  0x9b   : > { %p787_p3 = pneg %p786_p11 }
  0x9c   : > { %p793_p7 = por %p792_p0, %p791_p8 }
  0x9e   : > { %p794_p13 = pnand %p793_p7, %p787_p3 }
  0xa0   : > { %797 = shalt.err (!%p794_p13)
}
  0xa1   : > { %s864_s21 = smov 128   ;;  %s865_s15 = smov 8  }
  0xa2   : > { %632 = dma.vmem_to_hbm [thread:$0]  (%p1193_p5), %s1114_s28, 1536, %s1112_s27, %s470_s29, %s864_s21, %s864_s21, %s865_s15  }
  0xa3 PF: > { %s500_s19 = sand.u32 1, %s836_s9   ;;  %p1194_p10 = scmp.ne.s32.totalorder %s1187_s24, 0 }
  0xa4   : > { %p1195_p12 = scmp.ge.s32.totalorder %s856_s14, 2  ;;  %s501_s12 = scalar_lea.sflag [#allocation7], %s500_s19 }
  0xa6   : > { %p642_p1 = pnand %p1195_p12, %p1194_p10 }
  0xa8   : > { %831 = dma.done.wait (!%p642_p1), %s501_s12, 1536  }
  0xa9   : > { %833 = vsyncadd (!%p642_p1), %s501_s12, 4294965760  ;;  %s21_s14 = sadd.s32 1, %s856_s14   ;;  %s1196_s9 = smov %s840_s10 }
  0xaa   : > { %p18_p2 = scmp.ge.s32.totalorder %s21_s14, 4   ;;  %s1197_s10 = smov %s844_s11 }
  0xab   : > { %s1198_s11 = smov %s937_s23  ;;  %s1199_s12 = smov %s852_s13 }
  0xac   : > { %s1200_s13 = smov %s1202_s17  ;;  %20 = sbr.rel (!%p18_p2) target bundleno = 8 (0x8), region = 108 }
  0xb3   :  { %506 = vsyncpa [#allocation6], 1 }
  0xb4   :  { %508 = vsyncpa [#allocation6 + $0x1], 1 }
  0xb5   :  { %509 = vsyncpa [#allocation9], 1 }
  0xb6   :  { %511 = vsyncpa [#allocation9 + $0x1], 1 }
  0xb7   :  { %512 = vsyncpa [#allocation7], 1 }
  0xb8   :  { %514 = vsyncpa [#allocation7 + $0x1], 1 }

</bundles_post_ra>
